<compile_context>
chip_gen: v6e
topology: v6e:2x2x1
jax: 0.10.0
libtpu: 0.0.40
codegen_flags: <defaults>
</compile_context>

<pallas_src>
import functools

import jax
import jax.numpy as jnp
from jax.experimental import pallas as pl
from jax.experimental.pallas import tpu as pltpu

_SUBLANE = 8        # f32 sublane pack (x tiles are f32)
_ROW_ALIGN = 16     # bf16 sublane pack (y tiles are bf16)
_TB_MAX = 1024      # batch-tile cap (~7.5 MiB working set incl. double buffers)
_SPLIT_ROWS = 256   # batches this large always get >= 2 grid steps (v7x dual-TC)


def _round_up(n, m):
    return ((n + m - 1) // m) * m


# ----------------------------------------------------------------------------
# Kernel: masked-linear -> ReLU -> masked-linear -> ReLU -> linear (one x tile)
# Masks are already folded into the (bf16, padded, transposed) weights.
# ----------------------------------------------------------------------------
def _subnet_mlp_kernel(x_ref, w1_ref, w2_ref, wl_ref, y_ref):
    # In-kernel bf16 cast rides the VPU slot (plenty of slack under MXU/DMA).
    x = x_ref[...].astype(jnp.bfloat16)
    h1 = jnp.dot(x, w1_ref[...], preferred_element_type=jnp.float32)
    h1 = jnp.maximum(h1, 0.0).astype(jnp.bfloat16)            # ReLU
    h2 = jnp.dot(h1, w2_ref[...], preferred_element_type=jnp.float32)
    h2 = jnp.maximum(h2, 0.0).astype(jnp.bfloat16)            # ReLU
    y = jnp.dot(h2, wl_ref[...], preferred_element_type=jnp.float32)
    y_ref[...] = y.astype(y_ref.dtype)                        # bf16 writeback


# ----------------------------------------------------------------------------
# One-time parameter prep (outside the per-step jitted path):
#   fold mask, transpose (out,in)->(in,out), zero-pad lane dims to 128, cast bf16.
# Zero padding guarantees the padded lanes contribute exact zeros everywhere.
# ----------------------------------------------------------------------------
def prepare_subnet_params(params, masks, task_id):
    w1 = params["fc1.weight"] * masks["fc1.weight"].astype(jnp.float32)   # (H, 784)
    w2 = params["fc2.weight"] * masks["fc2.weight"].astype(jnp.float32)   # (H, H)
    wl = params[f"last.{task_id}.weight"]                                 # (C, H)

    in_feat = w1.shape[1]
    n_hidden = w1.shape[0]
    n_classes = wl.shape[0]
    h_pad = _round_up(max(n_hidden, 128), 128)
    c_pad = _round_up(max(n_classes, 128), 128)

    w1t = jnp.zeros((in_feat, h_pad), jnp.float32).at[:, :n_hidden].set(w1.T)
    w2t = jnp.zeros((h_pad, h_pad), jnp.float32).at[:n_hidden, :n_hidden].set(w2.T)
    wlt = jnp.zeros((h_pad, c_pad), jnp.float32).at[:n_hidden, :n_classes].set(wl.T)

    return {
        "w1": jax.device_put(w1t.astype(jnp.bfloat16)),
        "w2": jax.device_put(w2t.astype(jnp.bfloat16)),
        "wl": jax.device_put(wlt.astype(jnp.bfloat16)),
        "n_classes": int(n_classes),
    }


# ----------------------------------------------------------------------------
# Batch tiling: balanced tiles, capped at _TB_MAX, >= 2 tiles for large batches
# (v7x 2-TC sharding of the "parallel" axis), rows 16-aligned (bf16 out pack)
# unless a single full-array tile is used.
# ----------------------------------------------------------------------------
def _choose_batch_tiling(bsz):
    rows = _round_up(bsz, _SUBLANE)
    n_tiles = pl.cdiv(rows, _TB_MAX)
    if rows >= _SPLIT_ROWS:
        n_tiles = max(n_tiles, 2)
    tb = min(_round_up(pl.cdiv(rows, n_tiles), _ROW_ALIGN), rows)
    n_tiles = pl.cdiv(rows, tb)
    return rows, tb, n_tiles


# ----------------------------------------------------------------------------
# Jitted forward: flatten, tile the batch, run the kernel, slice the result.
# ----------------------------------------------------------------------------
@functools.partial(jax.jit, static_argnames=("n_classes", "single_buffer_weights"))
def _subnet_mlp_forward_jit(x, w1, w2, wl, n_classes, single_buffer_weights):
    bsz = x.shape[0]
    x2d = x.reshape(bsz, -1)           # native dtype; bf16 cast happens in-kernel
    in_feat = x2d.shape[1]
    h_pad = w1.shape[1]
    c_pad = wl.shape[1]

    rows, tb, n_tiles = _choose_batch_tiling(bsz)
    if rows != bsz:                    # only when bsz is not sublane-aligned
        x2d = jnp.pad(x2d, ((0, rows - bsz), (0, 0)))
    # Tiles that do not evenly divide `rows` are handled by Pallas boundary
    # blocks; pad-region garbage only feeds rows dropped by the final slice.

    def _const_spec(shape):
        # Grid-invariant weights: stay VMEM-resident; single-buffer when possible.
        if single_buffer_weights:
            return pl.BlockSpec(shape, lambda i: (0, 0),
                                pipeline_mode=pl.Buffered(1))
        return pl.BlockSpec(shape, lambda i: (0, 0))

    y_pad = pl.pallas_call(
        _subnet_mlp_kernel,
        out_shape=jax.ShapeDtypeStruct((rows, c_pad), jnp.bfloat16),
        grid=(n_tiles,),
        in_specs=[
            pl.BlockSpec((tb, in_feat), lambda i: (i, 0)),    # x tile, pipelined
            _const_spec((in_feat, h_pad)),                    # fc1 weight
            _const_spec((h_pad, h_pad)),                      # fc2 weight
            _const_spec((h_pad, c_pad)),                      # task head weight
        ],
        out_specs=pl.BlockSpec((tb, c_pad), lambda i: (i, 0)),
        compiler_params=pltpu.CompilerParams(
            dimension_semantics=("parallel",),                # megacore / v7x 2-TC
            vmem_limit_bytes=32 * 1024 * 1024),
    )(x2d, w1, w2, wl)

    return y_pad[:bsz, :n_classes].astype(jnp.float32)


_SINGLE_BUFFER_WEIGHTS = [hasattr(pl, "Buffered")]


def subnet_mlp_forward(x, prep):
    """Mirrors SubnetMLPNet.forward(x, task_id, mask) given prepared params."""
    args = (x, prep["w1"], prep["w2"], prep["wl"])
    try:
        return _subnet_mlp_forward_jit(
            *args, n_classes=prep["n_classes"],
            single_buffer_weights=_SINGLE_BUFFER_WEIGHTS[0])
    except Exception:
        if not _SINGLE_BUFFER_WEIGHTS[0]:
            raise
        # pl.Buffered(1) not supported on this build: fall back to default
        # double-buffered (still grid-invariant / VMEM-resident) weight specs.
        _SINGLE_BUFFER_WEIGHTS[0] = False
        return _subnet_mlp_forward_jit(
            *args, n_classes=prep["n_classes"], single_buffer_weights=False)


# ----------------------------------------------------------------------------
# Helpers for the self-test.
# ----------------------------------------------------------------------------
def _make_mask(key, shape, sparsity):
    """Deterministic binary weight mask: keep the top (1 - sparsity) scores,
    mimicking SubnetLinear's popup-score thresholding / get_masks()."""
    scores = jax.random.normal(key, shape, dtype=jnp.float32)
    thresh = jnp.quantile(scores, sparsity)
    return (scores > thresh).astype(jnp.float32)


def _reference_forward(x, params, masks, task_id):
    """Pure-JAX f32 reference for correctness."""
    bsz = x.shape[0]
    h = x.reshape(bsz, -1).astype(jnp.float32)
    h = jnp.maximum(h @ (params["fc1.weight"] * masks["fc1.weight"]).T, 0.0)
    h = jnp.maximum(h @ (params["fc2.weight"] * masks["fc2.weight"]).T, 0.0)
    return h @ params[f"last.{task_id}.weight"].T


if __name__ == "__main__":
    # Small, deterministic configuration consistent with the module:
    # input features fixed at 784 (1x28x28), small hidden width, 2 task heads.
    key = jax.random.PRNGKey(0)
    k_x, k_w1, k_w2, k_l0, k_l1, k_m1, k_m2 = jax.random.split(key, 7)

    batch = 4
    n_hidden = 32
    sparsity = 0.5
    taskcla = [(0, 10), (1, 10)]
    task_id = 0

    x = jax.random.normal(k_x, (batch, 1, 28, 28), dtype=jnp.float32)

    params = {
        # nn.Linear weight convention: (out_features, in_features), bias=False.
        "fc1.weight": jax.random.normal(k_w1, (n_hidden, 784), jnp.float32) * 0.05,
        "fc2.weight": jax.random.normal(k_w2, (n_hidden, n_hidden), jnp.float32) * 0.1,
        "last.0.weight": jax.random.normal(k_l0, (taskcla[0][1], n_hidden), jnp.float32) * 0.1,
        "last.1.weight": jax.random.normal(k_l1, (taskcla[1][1], n_hidden), jnp.float32) * 0.1,
    }
    masks = {
        "fc1.weight": _make_mask(k_m1, (n_hidden, 784), sparsity),
        "fc2.weight": _make_mask(k_m2, (n_hidden, n_hidden), sparsity),
        "fc1.bias": None,   # bias=False throughout, kept for interface parity
        "fc2.bias": None,
    }

    # TODO(synk): self.act activation caching and in-module train-mode popup-score
    # thresholding are training-time bookkeeping with no forward-output effect;
    # binary masks are taken as inputs (as produced by get_masks()).

    prep = prepare_subnet_params(params, masks, task_id)     # one-time init work
    y = subnet_mlp_forward(x, prep)
    y = jax.block_until_ready(y)

    y_ref = _reference_forward(x, params, masks, task_id)
    assert y.shape == (batch, taskcla[task_id][1])
    assert jnp.allclose(y, y_ref, atol=1e-2, rtol=1e-2), (
        float(jnp.max(jnp.abs(y - y_ref))))

    print("KERNEL_OK")
</pallas_src>

<mosaic_0001>
module attributes {stable_mosaic.version = 11 : i64} {
  func.func @_subnet_mlp_kernel(%arg0: i32, %arg1: memref<8x784xf32, #tpu.memory_space<vmem>>, %arg2: memref<784x128xbf16, #tpu.memory_space<vmem>>, %arg3: memref<128x128xbf16, #tpu.memory_space<vmem>>, %arg4: memref<128x128xbf16, #tpu.memory_space<vmem>>, %arg5: memref<8x128xbf16, #tpu.memory_space<vmem>>) attributes {dimension_semantics = [#tpu.dimension_semantics<parallel>], iteration_bounds = array<i64: 1>, scalar_prefetch = 0 : i64, scratch_operands = 0 : i64, tpu.core_type = #tpu.core_type<tc>, window_params = [{transform_indices = @transform_0, window_bounds = array<i64: 8, 784>}, {pipeline_mode = #tpu.pipeline_mode<synchronous>, transform_indices = @transform_1, window_bounds = array<i64: 784, 128>}, {pipeline_mode = #tpu.pipeline_mode<synchronous>, transform_indices = @transform_2, window_bounds = array<i64: 128, 128>}, {pipeline_mode = #tpu.pipeline_mode<synchronous>, transform_indices = @transform_3, window_bounds = array<i64: 128, 128>}, {transform_indices = @transform_4, window_bounds = array<i64: 8, 128>}]} {
    %c0 = arith.constant 0 : index
    %c0_0 = arith.constant 0 : index
    %0 = vector.load %arg1[%c0, %c0_0] : memref<8x784xf32, #tpu.memory_space<vmem>>, vector<8x784xf32>
    %1 = arith.truncf %0 : vector<8x784xf32> to vector<8x784xbf16>
    %c0_1 = arith.constant 0 : index
    %c0_2 = arith.constant 0 : index
    %2 = vector.load %arg2[%c0_1, %c0_2] : memref<784x128xbf16, #tpu.memory_space<vmem>>, vector<784x128xbf16>
    %cst = arith.constant dense<0.000000e+00> : vector<8x128xf32>
    %3 = tpu.matmul %1, %2, %cst {dimension_numbers = #tpu.dot_dimension_numbers<[1], [0], [0], [1], [0, 0, 1, 1], [], []>} : vector<8x784xbf16>, vector<784x128xbf16>, vector<8x128xf32> -> vector<8x128xf32>
    %cst_3 = arith.constant 0.000000e+00 : f32
    %4 = vector.broadcast %cst_3 : f32 to vector<8x128xf32>
    %5 = arith.maximumf %3, %4 : vector<8x128xf32>
    %6 = arith.truncf %5 : vector<8x128xf32> to vector<8x128xbf16>
    %c0_4 = arith.constant 0 : index
    %c0_5 = arith.constant 0 : index
    %7 = vector.load %arg3[%c0_4, %c0_5] : memref<128x128xbf16, #tpu.memory_space<vmem>>, vector<128x128xbf16>
    %cst_6 = arith.constant dense<0.000000e+00> : vector<8x128xf32>
    %8 = tpu.matmul %6, %7, %cst_6 {dimension_numbers = #tpu.dot_dimension_numbers<[1], [0], [0], [1], [0, 0, 1, 1], [], []>} : vector<8x128xbf16>, vector<128x128xbf16>, vector<8x128xf32> -> vector<8x128xf32>
    %cst_7 = arith.constant 0.000000e+00 : f32
    %9 = vector.broadcast %cst_7 : f32 to vector<8x128xf32>
    %10 = arith.maximumf %8, %9 : vector<8x128xf32>
    %11 = arith.truncf %10 : vector<8x128xf32> to vector<8x128xbf16>
    %c0_8 = arith.constant 0 : index
    %c0_9 = arith.constant 0 : index
    %12 = vector.load %arg4[%c0_8, %c0_9] : memref<128x128xbf16, #tpu.memory_space<vmem>>, vector<128x128xbf16>
    %cst_10 = arith.constant dense<0.000000e+00> : vector<8x128xf32>
    %13 = tpu.matmul %11, %12, %cst_10 {dimension_numbers = #tpu.dot_dimension_numbers<[1], [0], [0], [1], [0, 0, 1, 1], [], []>} : vector<8x128xbf16>, vector<128x128xbf16>, vector<8x128xf32> -> vector<8x128xf32>
    %14 = arith.truncf %13 : vector<8x128xf32> to vector<8x128xbf16>
    %c0_11 = arith.constant 0 : index
    %c0_12 = arith.constant 0 : index
    %15 = vector.load %arg5[%c0_11, %c0_12] : memref<8x128xbf16, #tpu.memory_space<vmem>>, vector<8x128xbf16>
    tpu.vector_store %arg5[%c0_11, %c0_12], %14 {strides = array<i32>} : memref<8x128xbf16, #tpu.memory_space<vmem>>, vector<8x128xbf16>,
    return
  }
  func.func @transform_0(%arg0: i32) -> (i32, i32) {
    %c0_i32 = arith.constant 0 : i32
    %c0_i32_0 = arith.constant 0 : i32
    return %arg0, %c0_i32 : i32, i32
  }
  func.func @transform_1(%arg0: i32) -> (i32, i32) {
    %c0_i32 = arith.constant 0 : i32
    %c0_i32_0 = arith.constant 0 : i32
    %c0_i32_1 = arith.constant 0 : i32
    return %c0_i32, %c0_i32_0 : i32, i32
  }
  func.func @transform_2(%arg0: i32) -> (i32, i32) {
    %c0_i32 = arith.constant 0 : i32
    %c0_i32_0 = arith.constant 0 : i32
    %c0_i32_1 = arith.constant 0 : i32
    return %c0_i32, %c0_i32_0 : i32, i32
  }
  func.func @transform_3(%arg0: i32) -> (i32, i32) {
    %c0_i32 = arith.constant 0 : i32
    %c0_i32_0 = arith.constant 0 : i32
    %c0_i32_1 = arith.constant 0 : i32
    return %c0_i32, %c0_i32_0 : i32, i32
  }
  func.func @transform_4(%arg0: i32) -> (i32, i32) {
    %c0_i32 = arith.constant 0 : i32
    %c0_i32_0 = arith.constant 0 : i32
    return %arg0, %c0_i32 : i32, i32
  }
}

module attributes {stable_mosaic.version = 11 : i64} {
  func.func @_subnet_mlp_kernel(%arg0: i32, %arg1: memref<8x784xf32, #tpu.memory_space<vmem>>, %arg2: memref<784x128xbf16, #tpu.memory_space<vmem>>, %arg3: memref<128x128xbf16, #tpu.memory_space<vmem>>, %arg4: memref<128x128xbf16, #tpu.memory_space<vmem>>, %arg5: memref<8x128xbf16, #tpu.memory_space<vmem>>) attributes {dimension_semantics = [#tpu.dimension_semantics<parallel>], iteration_bounds = array<i64: 1>, scalar_prefetch = 0 : i64, scratch_operands = 0 : i64, tpu.core_type = #tpu.core_type<tc>, window_params = [{transform_indices = @transform_0, window_bounds = array<i64: 8, 784>}, {pipeline_mode = #tpu.pipeline_mode<synchronous>, transform_indices = @transform_1, window_bounds = array<i64: 784, 128>}, {pipeline_mode = #tpu.pipeline_mode<synchronous>, transform_indices = @transform_2, window_bounds = array<i64: 128, 128>}, {pipeline_mode = #tpu.pipeline_mode<synchronous>, transform_indices = @transform_3, window_bounds = array<i64: 128, 128>}, {transform_indices = @transform_4, window_bounds = array<i64: 8, 128>}]} {
    %c0 = arith.constant 0 : index
    %c0_0 = arith.constant 0 : index
    %0 = vector.load %arg1[%c0, %c0_0] : memref<8x784xf32, #tpu.memory_space<vmem>>, vector<8x784xf32>
    %1 = arith.truncf %0 : vector<8x784xf32> to vector<8x784xbf16>
    %c0_1 = arith.constant 0 : index
    %c0_2 = arith.constant 0 : index
    %2 = vector.load %arg2[%c0_1, %c0_2] : memref<784x128xbf16, #tpu.memory_space<vmem>>, vector<784x128xbf16>
    %cst = arith.constant dense<0.000000e+00> : vector<8x128xf32>
    %3 = tpu.matmul %1, %2, %cst {dimension_numbers = #tpu.dot_dimension_numbers<[1], [0], [0], [1], [0, 0, 1, 1], [], []>} : vector<8x784xbf16>, vector<784x128xbf16>, vector<8x128xf32> -> vector<8x128xf32>
    %cst_3 = arith.constant 0.000000e+00 : f32
    %4 = vector.broadcast %cst_3 : f32 to vector<8x128xf32>
    %5 = arith.maximumf %3, %4 : vector<8x128xf32>
    %6 = arith.truncf %5 : vector<8x128xf32> to vector<8x128xbf16>
    %c0_4 = arith.constant 0 : index
    %c0_5 = arith.constant 0 : index
    %7 = vector.load %arg3[%c0_4, %c0_5] : memref<128x128xbf16, #tpu.memory_space<vmem>>, vector<128x128xbf16>
    %cst_6 = arith.constant dense<0.000000e+00> : vector<8x128xf32>
    %8 = tpu.matmul %6, %7, %cst_6 {dimension_numbers = #tpu.dot_dimension_numbers<[1], [0], [0], [1], [0, 0, 1, 1], [], []>} : vector<8x128xbf16>, vector<128x128xbf16>, vector<8x128xf32> -> vector<8x128xf32>
    %cst_7 = arith.constant 0.000000e+00 : f32
    %9 = vector.broadcast %cst_7 : f32 to vector<8x128xf32>
    %10 = arith.maximumf %8, %9 : vector<8x128xf32>
    %11 = arith.truncf %10 : vector<8x128xf32> to vector<8x128xbf16>
    %c0_8 = arith.constant 0 : index
    %c0_9 = arith.constant 0 : index
    %12 = vector.load %arg4[%c0_8, %c0_9] : memref<128x128xbf16, #tpu.memory_space<vmem>>, vector<128x128xbf16>
    %cst_10 = arith.constant dense<0.000000e+00> : vector<8x128xf32>
    %13 = tpu.matmul %11, %12, %cst_10 {dimension_numbers = #tpu.dot_dimension_numbers<[1], [0], [0], [1], [0, 0, 1, 1], [], []>} : vector<8x128xbf16>, vector<128x128xbf16>, vector<8x128xf32> -> vector<8x128xf32>
    %14 = arith.truncf %13 : vector<8x128xf32> to vector<8x128xbf16>
    %c0_11 = arith.constant 0 : index
    %c0_12 = arith.constant 0 : index
    %15 = vector.load %arg5[%c0_11, %c0_12] : memref<8x128xbf16, #tpu.memory_space<vmem>>, vector<8x128xbf16>
    tpu.vector_store %arg5[%c0_11, %c0_12], %14 {strides = array<i32>} : memref<8x128xbf16, #tpu.memory_space<vmem>>, vector<8x128xbf16>,
    return
  }
  func.func @transform_0(%arg0: i32) -> (i32, i32) {
    %c0_i32 = arith.constant 0 : i32
    %c0_i32_0 = arith.constant 0 : i32
    return %arg0, %c0_i32 : i32, i32
  }
  func.func @transform_1(%arg0: i32) -> (i32, i32) {
    %c0_i32 = arith.constant 0 : i32
    %c0_i32_0 = arith.constant 0 : i32
    %c0_i32_1 = arith.constant 0 : i32
    return %c0_i32, %c0_i32_0 : i32, i32
  }
  func.func @transform_2(%arg0: i32) -> (i32, i32) {
    %c0_i32 = arith.constant 0 : i32
    %c0_i32_0 = arith.constant 0 : i32
    %c0_i32_1 = arith.constant 0 : i32
    return %c0_i32, %c0_i32_0 : i32, i32
  }
  func.func @transform_3(%arg0: i32) -> (i32, i32) {
    %c0_i32 = arith.constant 0 : i32
    %c0_i32_0 = arith.constant 0 : i32
    %c0_i32_1 = arith.constant 0 : i32
    return %c0_i32, %c0_i32_0 : i32, i32
  }
  func.func @transform_4(%arg0: i32) -> (i32, i32) {
    %c0_i32 = arith.constant 0 : i32
    %c0_i32_0 = arith.constant 0 : i32
    return %arg0, %c0_i32 : i32, i32
  }
}

</mosaic_0001>

<bundles_post_ra>
// kernel: _subnet_mlp_forward_jit.1
= control target key start
LH: loop header
LB: loop body
LE: loop exit
PB: predicated region body
PF: predicated region fallthrough
CT: control target
= control target key end

     0   :  { %9 = vsyncpa [#allocation3], 0  ;;  %s1111_s15 = smov [#allocation2]   ;;  %s1362_s0 = inlined_call_operand.vmem [shape: f32[8,784], index: 0, kind: input, shape index: {}]   ;;  %s1363_s1 = inlined_call_operand.vmem [shape: bf16[784,128], index: 1, kind: input, shape index: {}]   ;;  %s1364_s2 = inlined_call_operand.vmem [shape: bf16[128,128], index: 2, kind: input, shape index: {}]   ;;  %s1365_s3 = inlined_call_operand.hbm [shape: bf16[128,128], index: 3, kind: input, shape index: {}]   ;;  %s1366_s4 = inlined_call_operand.vmem [shape: bf16[8,128], index: 4, kind: output, shape index: {}]  }
   0x1   :  { %s21_s16 = sshll.u32 %s1111_s15, 4  ;;  %s22_s16 = int_to_ptr.vmem [resolvable:$true] %s21_s16 }
   0x2   :  { %s1097_s17 = scalar_lea.vmem %s22_s16, 1024  ;;  %p1102_p1 = scmp.lt.s32.totalorder %s22_s16, %s22_s16 }
   0x3   :  { %p1098_p0 = scmp.ne.s32.totalorder %s22_s16, %s1097_s17  ;;  %p1103_p2 = scmp.lt.s32.totalorder %s1097_s17, %s1097_s17 }
   0x5   :  { %p1104_p3 = por %p1103_p2, %p1102_p1 }
   0x7   :  { %p1105_p4 = pnand %p1104_p3, %p1098_p0 }
   0x9   :  { %1108 = shalt.err (!%p1105_p4)
}
   0xa   :  { %s1112_s18 = smov 64   ;;  %s1113_s19 = smov 4  }
   0xb   :  { %27 = dma.hbm_to_vmem [thread:$0]  %s1365_s3, 1024, %s22_s16, [#allocation3], %s1112_s18, %s1112_s18, %s1113_s19  }
   0xc   :  { %1109 = dma.done.wait [#allocation3], 1024  }
   0xd   :  { %1110 = vsyncadd [#allocation3], 4294966272  ;;  %v1024_v0 = vld [vmem:[%s1363_s1 + $0x78] sm:$0xff]   ;;  %v1028_v4 = vld [vmem:[%s1363_s1 + $0x70] sm:$0xff]   ;;  %v1114_v41 = vmov 0.0   ;;  %vm1115_vm0 = vmmov 0  }
   0xe   :  { %v1025_v1 = vld [vmem:[%s1363_s1 + $0xf8] sm:$0xff]   ;;  %887 = vmatprep.subr.bf16.mxu0 %v1024_v0  ;;  %v1029_v5 = vld [vmem:[%s1363_s1 + $0xf0] sm:$0xff]   ;;  %v1032_v8 = vld [vmem:[%s1363_s1 + $0x68] sm:$0xff]   ;;  %vm438_vm1 = vcmask 130048  }
   0xf   :  { %v1026_v2 = vld [vmem:[%s1363_s1 + $0x38] sm:$0xff]   ;;  %909 = vmatprep.subr.bf16.mxu1 %v1025_v1  ;;  %v1030_v6 = vld [vmem:[%s1363_s1 + $0x30] sm:$0xff]   ;;  %v1033_v9 = vld [vmem:[%s1363_s1 + $0xe8] sm:$0xff]  }
  0x10   :  { %v1027_v3 = vld [vmem:[%s1363_s1 + $0xb8] sm:$0xff]   ;;  %888 = vmatpush3.bf16.msra.mxu0 %v1026_v2  ;;  %v1031_v7 = vld [vmem:[%s1363_s1 + $0xb0] sm:$0xff]   ;;  %v1034_v10 = vld [vmem:[%s1363_s1 + $0x28] sm:$0xff]  }
  0x11   :  { %910 = vmatpush3.bf16.msra.mxu1 %v1027_v3  ;;  %889 = vmatprep.subr.bf16.mxu0 %v1028_v4  ;;  %v1035_v11 = vld [vmem:[%s1363_s1 + $0xa8] sm:$0xff]   ;;  %v1036_v12 = vld [vmem:[%s1363_s1 + $0x60] sm:$0xff]   ;;  %v1040_v16 = vld [vmem:[%s1363_s1 + $0x58] sm:$0xff]  }
  0x12   :  { %911 = vmatprep.subr.bf16.mxu1 %v1029_v5  ;;  %v1037_v13 = vld [vmem:[%s1363_s1 + $0xe0] sm:$0xff]   ;;  %v1041_v17 = vld [vmem:[%s1363_s1 + $0xd8] sm:$0xff]   ;;  %v1044_v20 = vld [vmem:[%s1363_s1 + $0x50] sm:$0xff]  }
  0x13   :  { %v1038_v14 = vld [vmem:[%s1363_s1 + $0x20] sm:$0xff]   ;;  %v1042_v18 = vld [vmem:[%s1363_s1 + $0x18] sm:$0xff]   ;;  %v1045_v21 = vld [vmem:[%s1363_s1 + $0xd0] sm:$0xff]  }
  0x14   :  { %890 = vmatpush3.bf16.msra.mxu0 %v1030_v6  ;;  %v1039_v15 = vld [vmem:[%s1363_s1 + $0xa0] sm:$0xff]   ;;  %v1043_v19 = vld [vmem:[%s1363_s1 + $0x98] sm:$0xff]   ;;  %v1046_v22 = vld [vmem:[%s1363_s1 + $0x10] sm:$0xff]  }
  0x15   :  { %912 = vmatpush3.bf16.msra.mxu1 %v1031_v7  ;;  %891 = vmatprep.subr.bf16.mxu0 %v1032_v8  ;;  %v1047_v23 = vld [vmem:[%s1363_s1 + $0x90] sm:$0xff]   ;;  %v1048_v24 = vld [vmem:[%s1363_s1 + $0x48] sm:$0xff]   ;;  %v1052_v28 = vld [vmem:[%s1363_s1 + $0x40] sm:$0xff]  }
  0x16   :  { %913 = vmatprep.subr.bf16.mxu1 %v1033_v9  ;;  %v1049_v25 = vld [vmem:[%s1363_s1 + $0xc8] sm:$0xff]   ;;  %v1053_v29 = vld [vmem:[%s1363_s1 + $0xc0] sm:$0xff]   ;;  %v35_v33 = vld [vmem:[%s1362_s0 + $0x18] sm:$0xff] }
  0x17   :  { %v1050_v26 = vld [vmem:[%s1363_s1 + $0x8] sm:$0xff]   ;;  %v1054_v30 = vld [vmem:[%s1363_s1] sm:$0xff]   ;;  %v42_v36 = vpack.c.bf16 %v35_v33, %v35_v33  ;;  %v34_v38 = vld [vmem:[%s1362_s0 + $0x10] sm:$0xff] }
  0x18   :  { %892 = vmatpush3.bf16.msra.mxu0 %v1034_v10  ;;  %v1051_v27 = vld [vmem:[%s1363_s1 + $0x88] sm:$0xff]   ;;  %v1055_v31 = vld [vmem:[%s1363_s1 + $0x80] sm:$0xff]   ;;  %v41_v39 = vpack.c.bf16 %v34_v38, %v34_v38  ;;  %v1056_v40 = vld [vmem:[%s1363_s1 + $0x178] sm:$0xff]  }
  0x19   :  { %914 = vmatpush3.bf16.msra.mxu1 %v1035_v11  ;;  %893 = vmatprep.subr.bf16.mxu0 %v1036_v12  ;;  %v33_v32 = vld [vmem:[%s1362_s0 + $0x8] sm:$0xff]  ;;  %v32_v34 = vld [vmem:[%s1362_s0] sm:$0xff]  ;;  %v1057_v42 = vld [vmem:[%s1363_s1 + $0x138] sm:$0xff]  }
  0x1a   :  { %915 = vmatprep.subr.bf16.mxu1 %v1037_v13  ;;  %v40_v35 = vpack.c.bf16 %v33_v32, %v33_v32  ;;  %v39_v37 = vpack.c.bf16 %v32_v34, %v32_v34  ;;  %514 = vmatprep.mubr.bf16.mxu1 %v42_v36  ;;  %v1058_v43 = vld [vmem:[%s1363_s1 + $0x170] sm:$0xff]   ;;  %v1060_v45 = vld [vmem:[%s1363_s1 + $0x168] sm:$0xff]   ;;  %v1062_v47 = vld [vmem:[%s1363_s1 + $0x160] sm:$0xff]  }
  0x1b   :  { %v1059_v44 = vld [vmem:[%s1363_s1 + $0x130] sm:$0xff]   ;;  %v1061_v46 = vld [vmem:[%s1363_s1 + $0x128] sm:$0xff]   ;;  %v1063_v48 = vld [vmem:[%s1363_s1 + $0x120] sm:$0xff]  }
  0x1c   :  { %894 = vmatpush3.bf16.msra.mxu0 %v1038_v14  ;;  %474 = vmatprep.mubr.bf16.mxu0 %v40_v35  ;;  %v1064_v49 = vld [vmem:[%s1363_s1 + $0x158] sm:$0xff]   ;;  %v1066_v51 = vld [vmem:[%s1363_s1 + $0x150] sm:$0xff]   ;;  %v1072_v52 = vld [vmem:[%s1363_s1 + $0x180] sm:$0xff]  }
  0x1d   :  { %916 = vmatpush3.bf16.msra.mxu1 %v1039_v15  ;;  %895 = vmatprep.subr.bf16.mxu0 %v1040_v16  ;;  %v1065_v50 = vld [vmem:[%s1363_s1 + $0x118] sm:$0xff]   ;;  %v37_v53 = vld [vmem:[%s1362_s0 + $0x28] sm:$0xff]  ;;  %v38_v55 = vld [vmem:[%s1362_s0 + $0x30] sm:$0xff] }
  0x1e   :  { %917 = vmatprep.subr.bf16.mxu1 %v1041_v17  ;;  %v44_v54 = vpack.c.bf16 %v37_v53, %v37_v53  ;;  %v1067_v56 = vld [vmem:[%s1363_s1 + $0x110] sm:$0xff]   ;;  %v45_v57 = vpack.c.bf16 %v38_v55, %v38_v55  ;;  %v1068_v58 = vld [vmem:[%s1363_s1 + $0x148] sm:$0xff]   ;;  %v1070_v60 = vld [vmem:[%s1363_s1 + $0x140] sm:$0xff]  }
  0x1f   :  { %v1069_v59 = vld [vmem:[%s1363_s1 + $0x108] sm:$0xff]   ;;  %v1071_v61 = vld [vmem:[%s1363_s1 + $0x100] sm:$0xff]   ;;  %v1073_v0 = vld [vmem:[%s1364_s2 + $0x38] sm:$0xff]  }
  0x20   :  { %896 = vmatpush3.bf16.msra.mxu0 %v1042_v18  ;;  %v36_v62 = vld [vmem:[%s1362_s0 + $0x20] sm:$0xff]  ;;  %v1074_v1 = vld [vmem:[%s1364_s2 + $0x30] sm:$0xff]   ;;  %v1075_v2 = vld [vmem:[%s1364_s2 + $0x28] sm:$0xff]  }
  0x21   :  { %918 = vmatpush3.bf16.msra.mxu1 %v1043_v19  ;;  %897 = vmatprep.subr.bf16.mxu0 %v1044_v20  ;;  %v43_v63 = vpack.c.bf16 %v36_v62, %v36_v62  ;;  %v1076_v3 = vld [vmem:[%s1364_s2 + $0x20] sm:$0xff]   ;;  %v1077_v4 = vld [vmem:[%s1364_s2 + $0x18] sm:$0xff]   ;;  %v1078_v5 = vld [vmem:[%s1364_s2 + $0x10] sm:$0xff]  }
  0x22   :  { %919 = vmatprep.subr.bf16.mxu1 %v1045_v21  ;;  %v1079_v6 = vld [vmem:[%s1364_s2 + $0x8] sm:$0xff]   ;;  %v1080_v7 = vld [vmem:[%s1364_s2] sm:$0xff]   ;;  %v1081_v8 = vld [vmem:[#allocation2 + $0x38] sm:$0xff]  }
  0x23   :  { %v1082_v9 = vld [vmem:[#allocation2 + $0x30] sm:$0xff]   ;;  %v1083_v10 = vld [vmem:[#allocation2 + $0x28] sm:$0xff]   ;;  %v1084_v11 = vld [vmem:[#allocation2 + $0x20] sm:$0xff]  }
  0x24   :  { %898 = vmatpush3.bf16.msra.mxu0 %v1046_v22  ;;  %v1085_v12 = vld [vmem:[#allocation2 + $0x18] sm:$0xff]   ;;  %v1086_v13 = vld [vmem:[#allocation2 + $0x10] sm:$0xff]   ;;  %v1087_v14 = vld [vmem:[#allocation2 + $0x8] sm:$0xff]  }
  0x25   :  { %920 = vmatpush3.bf16.msra.mxu1 %v1047_v23  ;;  %899 = vmatprep.subr.bf16.mxu0 %v1048_v24 }
  0x26   :  { %921 = vmatprep.subr.bf16.mxu1 %v1049_v25 }
  0x28   :  { %900 = vmatpush3.bf16.msra.mxu0 %v1050_v26 }
  0x29   :  { %922 = vmatpush3.bf16.msra.mxu1 %v1051_v27  ;;  %901 = vmatprep.subr.bf16.mxu0 %v1052_v28 }
  0x2a   :  { %923 = vmatprep.subr.bf16.mxu1 %v1053_v29 }
  0x2c   :  { %902 = vmatpush3.bf16.msra.mxu0 %v1054_v30 }
  0x2d   :  { %924 = vmatpush3.bf16.msra.mxu1 %v1055_v31  ;;  %931 = vmatprep.subr.bf16.mxu0 %v1056_v40 }
  0x2e   :  { %973 = vmatprep.subr.bf16.mxu1 %v1114_v41 }
  0x2f   :  { %475 = vmatmul.mubr.bf16.vlgmr.msra.gmra.mxu0 %v39_v37 }
  0x30   :  { %515 = vmatmul.mubr.bf16.vlgmr.msra.gmra.mxu1 %v41_v39  ;;  %932 = vmatpush3.bf16.msra.mxu0 %v1057_v42  ;;  %v1088_v39 = vld [vmem:[#allocation2] sm:$0xff]  }
  0x31   :  { %975 = vmatprep.mubr.msk.bf16.mxu1 %vm1115_vm0, %v1114_v41  ;;  %933 = vmatprep.subr.bf16.mxu0 %v1058_v43 }
  0x32   :  { %974 = vmatpush3.bf16.msra.mxu1 %v1072_v52  ;;  %554 = vmatprep.mubr.bf16.mxu0 %v44_v54 }
  0x33   :  { %979 = vmatprep.subr.bf16.mxu1 %v1114_v41 }
  0x34   :  { %934 = vmatpush3.bf16.msra.mxu0 %v1059_v44 }
  0x35   :  { %935 = vmatprep.subr.bf16.mxu0 %v1060_v45 }
  0x38   :  { %936 = vmatpush3.bf16.msra.mxu0 %v1061_v46  ;;  %976 = vmatmul.mubr.msk.bf16.vlgmr.msra.gmra.mxu1 %vm438_vm1, %v45_v57 }
  0x39   :  { %937 = vmatprep.subr.bf16.mxu0 %v1062_v47  ;;  %995 = vmatprep.mubr.msk.bf16.mxu1 %vm1115_vm0, %v1114_v41 }
  0x3a   :  { %980 = vmatpush3.bf16.msra.mxu1 %v1073_v0 }
  0x3b   :  { %981 = vmatprep.subr.bf16.mxu1 %v1114_v41 }
  0x3c   :  { %938 = vmatpush3.bf16.msra.mxu0 %v1063_v48 }
  0x3d   :  { %939 = vmatprep.subr.bf16.mxu0 %v1064_v49 }
  0x3e   :  { %982 = vmatpush3.bf16.msra.mxu1 %v1074_v1 }
  0x3f   :  { %983 = vmatprep.subr.bf16.mxu1 %v1114_v41 }
  0x40   :  { %940 = vmatpush3.bf16.msra.mxu0 %v1065_v50 }
  0x41   :  { %941 = vmatprep.subr.bf16.mxu0 %v1066_v51 }
  0x42   :  { %984 = vmatpush3.bf16.msra.mxu1 %v1075_v2 }
  0x43   :  { %985 = vmatprep.subr.bf16.mxu1 %v1114_v41 }
  0x44   :  { %942 = vmatpush3.bf16.msra.mxu0 %v1067_v56 }
  0x45   :  { %943 = vmatprep.subr.bf16.mxu0 %v1068_v58 }
  0x46   :  { %986 = vmatpush3.bf16.msra.mxu1 %v1076_v3 }
  0x47   :  { %987 = vmatprep.subr.bf16.mxu1 %v1114_v41 }
  0x48   :  { %944 = vmatpush3.bf16.msra.mxu0 %v1069_v59 }
  0x49   :  { %945 = vmatprep.subr.bf16.mxu0 %v1070_v60 }
  0x4a   :  { %988 = vmatpush3.bf16.msra.mxu1 %v1077_v4 }
  0x4b   :  { %989 = vmatprep.subr.bf16.mxu1 %v1114_v41 }
  0x4c   :  { %946 = vmatpush3.bf16.msra.mxu0 %v1071_v61 }
  0x4d   :  { %999 = vmatprep.subr.bf16.mxu0 %v1114_v41 }
  0x4e   :  { %990 = vmatpush3.bf16.msra.mxu1 %v1078_v5 }
  0x4f   :  { %555 = vmatmul.mubr.bf16.vlgmr.msra.gmra.mxu0 %v43_v63  ;;  %991 = vmatprep.subr.bf16.mxu1 %v1114_v41 }
  0x50   :  { %1015 = vmatprep.mubr.msk.bf16.mxu0 %vm1115_vm0, %v1114_v41  ;;  %1000 = vmatpush3.bf16.msra.mxu0 %v1081_v8 }
  0x51   :  { %1001 = vmatprep.subr.bf16.mxu0 %v1114_v41 }
  0x52   :  { %992 = vmatpush3.bf16.msra.mxu1 %v1079_v6 }
  0x53   :  { %993 = vmatprep.subr.bf16.mxu1 %v1114_v41 }
  0x54   :  { %1002 = vmatpush3.bf16.msra.mxu0 %v1082_v9 }
  0x55   :  { %1003 = vmatprep.subr.bf16.mxu0 %v1114_v41 }
  0x56   :  { %994 = vmatpush3.bf16.msra.mxu1 %v1080_v7 }
  0x58   :  { %1004 = vmatpush3.bf16.msra.mxu0 %v1083_v10 }
  0x59   :  { %1005 = vmatprep.subr.bf16.mxu0 %v1114_v41 }
  0x5c   :  { %1006 = vmatpush3.bf16.msra.mxu0 %v1084_v11 }
  0x5d   :  { %1007 = vmatprep.subr.bf16.mxu0 %v1114_v41 }
  0x60   :  { %1008 = vmatpush3.bf16.msra.mxu0 %v1085_v12 }
  0x61   :  { %1009 = vmatprep.subr.bf16.mxu0 %v1114_v41 }
  0x64   :  { %1010 = vmatpush3.bf16.msra.mxu0 %v1086_v13 }
  0x65   :  { %1011 = vmatprep.subr.bf16.mxu0 %v1114_v41 }
  0x68   :  { %1012 = vmatpush3.bf16.msra.mxu0 %v1087_v14 }
  0x69   :  { %1013 = vmatprep.subr.bf16.mxu0 %v1114_v41 }
  0x6c   :  { %1014 = vmatpush3.bf16.msra.mxu0 %v1088_v39 }
  0xef   :  { %v903_v15 = vpop.f32.mrf.mxu0 }
  0xf0   :  { %v925_v16 = vpop.f32.mrf.mxu1 }
  0xf1   :  { %v904_v17 = vpop.f32.mrf.mxu0 }
  0xf2   :  { %v926_v18 = vpop.f32.mrf.mxu1  ;;  %v905_v27 = vadd.f32 %v904_v17, %v903_v15 }
  0xf3   :  { %v906_v19 = vpop.f32.mrf.mxu0  ;;  %v927_v28 = vadd.f32 %v926_v18, %v925_v16 }
  0xf4   :  { %v928_v20 = vpop.f32.mrf.mxu1 }
  0xf5   :  { %v907_v21 = vpop.f32.mrf.mxu0  ;;  %v517_v31 = vadd.f32 %v927_v28, %v905_v27 }
  0xf6   :  { %v929_v22 = vpop.f32.mrf.mxu1 }
  0xf8   :  { %v596_v23 = vpop.f32.mrf.mxu1 }
  0xfa   :  { %v977_v24 = vpop.f32.mrf.mxu1 }
  0xfc   :  { %v599_v25 = vpop.f32.mrf.mxu1 }
  0xfe   :  { %v978_v26 = vpop.f32.mrf.mxu1 }
 0x10f   :  { %v947_v29 = vpop.f32.mrf.mxu0 }
 0x111   :  { %v948_v30 = vpop.f32.mrf.mxu0 }
 0x112   :  { %v949_v32 = vadd.f32 %v948_v30, %v947_v29 }
 0x113   :  { %v950_v33 = vpop.f32.mrf.mxu0 }
 0x114   :  { %v557_v34 = vadd.f32 %v949_v32, %v517_v31 }
 0x115   :  { %v951_v35 = vpop.f32.mrf.mxu0 }
 0x116   :  { %v597_v36 = vadd.f32 %v596_v23, %v557_v34 }
 0x118   :  { %v602_v37 = vmax.f32 %v597_v36, 0.0 }
 0x11a   :  { %v603_v38 = vpack.c.bf16 %v602_v37, %v602_v37 }
 0x11c   :  { %996 = vmatmul.mubr.bf16.vlgmr.msra.gmra.mxu1 %v603_v38 }
 0x1dc   :  { %v702_v40 = vpop.f32.mrf.mxu1 }
 0x1dd   :  { %v708_v41 = vmax.f32 %v702_v40, 0.0 }
 0x1de   :  { %v997_v42 = vpop.f32.mrf.mxu1 }
 0x1df   :  { %v709_v43 = vpack.c.bf16 %v708_v41, %v708_v41 }
 0x1e0   :  { %v705_v44 = vpop.f32.mrf.mxu1 }
 0x1e1   :  { %1016 = vmatmul.mubr.bf16.vlgmr.msra.gmra.mxu0 %v709_v43 }
 0x1e2   :  { %v998_v45 = vpop.f32.mrf.mxu1 }
 0x2a1   :  { %v808_v46 = vpop.f32.mrf.mxu0 }
 0x2a2   :  { %v814_v47 = vpack.c.bf16 %v808_v46, %v808_v46 }
 0x2a3   :  { %v1017_v48 = vpop.f32.mrf.mxu0 }
 0x2a4   :  { %815 = vst [vmem:[%s1366_s4] sm:$0xf] %v814_v47 }
 0x2a5   :  { %v811_v49 = vpop.f32.mrf.mxu0 }
 0x2a7   :  { %v1018_v50 = vpop.f32.mrf.mxu0 }
 0x2a8   :  { %820 = vsyncpa [#allocation3], 1 }

// kernel: _subnet_mlp_forward_jit.1
= control target key start
LH: loop header
LB: loop body
LE: loop exit
PB: predicated region body
PF: predicated region fallthrough
CT: control target
= control target key end

     0   :  { %9 = vsyncpa [#allocation3], 0  ;;  %s1111_s15 = smov [#allocation2]   ;;  %s1362_s0 = inlined_call_operand.vmem [shape: f32[8,784], index: 0, kind: input, shape index: {}]   ;;  %s1363_s1 = inlined_call_operand.vmem [shape: bf16[784,128], index: 1, kind: input, shape index: {}]   ;;  %s1364_s2 = inlined_call_operand.vmem [shape: bf16[128,128], index: 2, kind: input, shape index: {}]   ;;  %s1365_s3 = inlined_call_operand.hbm [shape: bf16[128,128], index: 3, kind: input, shape index: {}]   ;;  %s1366_s4 = inlined_call_operand.vmem [shape: bf16[8,128], index: 4, kind: output, shape index: {}]  }
   0x1   :  { %s21_s16 = sshll.u32 %s1111_s15, 4  ;;  %s22_s16 = int_to_ptr.vmem [resolvable:$true] %s21_s16 }
   0x2   :  { %s1097_s17 = scalar_lea.vmem %s22_s16, 1024  ;;  %p1102_p1 = scmp.lt.s32.totalorder %s22_s16, %s22_s16 }
   0x3   :  { %p1098_p0 = scmp.ne.s32.totalorder %s22_s16, %s1097_s17  ;;  %p1103_p2 = scmp.lt.s32.totalorder %s1097_s17, %s1097_s17 }
   0x5   :  { %p1104_p3 = por %p1103_p2, %p1102_p1 }
   0x7   :  { %p1105_p4 = pnand %p1104_p3, %p1098_p0 }
   0x9   :  { %1108 = shalt.err (!%p1105_p4)
}
   0xa   :  { %s1112_s18 = smov 64   ;;  %s1113_s19 = smov 4  }
   0xb   :  { %27 = dma.hbm_to_vmem [thread:$0]  %s1365_s3, 1024, %s22_s16, [#allocation3], %s1112_s18, %s1112_s18, %s1113_s19  }
   0xc   :  { %1109 = dma.done.wait [#allocation3], 1024  }
   0xd   :  { %1110 = vsyncadd [#allocation3], 4294966272  ;;  %v1024_v0 = vld [vmem:[%s1363_s1 + $0x78] sm:$0xff]   ;;  %v1028_v4 = vld [vmem:[%s1363_s1 + $0x70] sm:$0xff]   ;;  %v1114_v41 = vmov 0.0   ;;  %vm1115_vm0 = vmmov 0  }
   0xe   :  { %v1025_v1 = vld [vmem:[%s1363_s1 + $0xf8] sm:$0xff]   ;;  %887 = vmatprep.subr.bf16.mxu0 %v1024_v0  ;;  %v1029_v5 = vld [vmem:[%s1363_s1 + $0xf0] sm:$0xff]   ;;  %v1032_v8 = vld [vmem:[%s1363_s1 + $0x68] sm:$0xff]   ;;  %vm438_vm1 = vcmask 130048  }
   0xf   :  { %v1026_v2 = vld [vmem:[%s1363_s1 + $0x38] sm:$0xff]   ;;  %909 = vmatprep.subr.bf16.mxu1 %v1025_v1  ;;  %v1030_v6 = vld [vmem:[%s1363_s1 + $0x30] sm:$0xff]   ;;  %v1033_v9 = vld [vmem:[%s1363_s1 + $0xe8] sm:$0xff]  }
  0x10   :  { %v1027_v3 = vld [vmem:[%s1363_s1 + $0xb8] sm:$0xff]   ;;  %888 = vmatpush3.bf16.msra.mxu0 %v1026_v2  ;;  %v1031_v7 = vld [vmem:[%s1363_s1 + $0xb0] sm:$0xff]   ;;  %v1034_v10 = vld [vmem:[%s1363_s1 + $0x28] sm:$0xff]  }
  0x11   :  { %910 = vmatpush3.bf16.msra.mxu1 %v1027_v3  ;;  %889 = vmatprep.subr.bf16.mxu0 %v1028_v4  ;;  %v1035_v11 = vld [vmem:[%s1363_s1 + $0xa8] sm:$0xff]   ;;  %v1036_v12 = vld [vmem:[%s1363_s1 + $0x60] sm:$0xff]   ;;  %v1040_v16 = vld [vmem:[%s1363_s1 + $0x58] sm:$0xff]  }
  0x12   :  { %911 = vmatprep.subr.bf16.mxu1 %v1029_v5  ;;  %v1037_v13 = vld [vmem:[%s1363_s1 + $0xe0] sm:$0xff]   ;;  %v1041_v17 = vld [vmem:[%s1363_s1 + $0xd8] sm:$0xff]   ;;  %v1044_v20 = vld [vmem:[%s1363_s1 + $0x50] sm:$0xff]  }
  0x13   :  { %v1038_v14 = vld [vmem:[%s1363_s1 + $0x20] sm:$0xff]   ;;  %v1042_v18 = vld [vmem:[%s1363_s1 + $0x18] sm:$0xff]   ;;  %v1045_v21 = vld [vmem:[%s1363_s1 + $0xd0] sm:$0xff]  }
  0x14   :  { %890 = vmatpush3.bf16.msra.mxu0 %v1030_v6  ;;  %v1039_v15 = vld [vmem:[%s1363_s1 + $0xa0] sm:$0xff]   ;;  %v1043_v19 = vld [vmem:[%s1363_s1 + $0x98] sm:$0xff]   ;;  %v1046_v22 = vld [vmem:[%s1363_s1 + $0x10] sm:$0xff]  }
  0x15   :  { %912 = vmatpush3.bf16.msra.mxu1 %v1031_v7  ;;  %891 = vmatprep.subr.bf16.mxu0 %v1032_v8  ;;  %v1047_v23 = vld [vmem:[%s1363_s1 + $0x90] sm:$0xff]   ;;  %v1048_v24 = vld [vmem:[%s1363_s1 + $0x48] sm:$0xff]   ;;  %v1052_v28 = vld [vmem:[%s1363_s1 + $0x40] sm:$0xff]  }
  0x16   :  { %913 = vmatprep.subr.bf16.mxu1 %v1033_v9  ;;  %v1049_v25 = vld [vmem:[%s1363_s1 + $0xc8] sm:$0xff]   ;;  %v1053_v29 = vld [vmem:[%s1363_s1 + $0xc0] sm:$0xff]   ;;  %v35_v33 = vld [vmem:[%s1362_s0 + $0x18] sm:$0xff] }
  0x17   :  { %v1050_v26 = vld [vmem:[%s1363_s1 + $0x8] sm:$0xff]   ;;  %v1054_v30 = vld [vmem:[%s1363_s1] sm:$0xff]   ;;  %v42_v36 = vpack.c.bf16 %v35_v33, %v35_v33  ;;  %v34_v38 = vld [vmem:[%s1362_s0 + $0x10] sm:$0xff] }
  0x18   :  { %892 = vmatpush3.bf16.msra.mxu0 %v1034_v10  ;;  %v1051_v27 = vld [vmem:[%s1363_s1 + $0x88] sm:$0xff]   ;;  %v1055_v31 = vld [vmem:[%s1363_s1 + $0x80] sm:$0xff]   ;;  %v41_v39 = vpack.c.bf16 %v34_v38, %v34_v38  ;;  %v1056_v40 = vld [vmem:[%s1363_s1 + $0x178] sm:$0xff]  }
  0x19   :  { %914 = vmatpush3.bf16.msra.mxu1 %v1035_v11  ;;  %893 = vmatprep.subr.bf16.mxu0 %v1036_v12  ;;  %v33_v32 = vld [vmem:[%s1362_s0 + $0x8] sm:$0xff]  ;;  %v32_v34 = vld [vmem:[%s1362_s0] sm:$0xff]  ;;  %v1057_v42 = vld [vmem:[%s1363_s1 + $0x138] sm:$0xff]  }
  0x1a   :  { %915 = vmatprep.subr.bf16.mxu1 %v1037_v13  ;;  %v40_v35 = vpack.c.bf16 %v33_v32, %v33_v32  ;;  %v39_v37 = vpack.c.bf16 %v32_v34, %v32_v34  ;;  %514 = vmatprep.mubr.bf16.mxu1 %v42_v36  ;;  %v1058_v43 = vld [vmem:[%s1363_s1 + $0x170] sm:$0xff]   ;;  %v1060_v45 = vld [vmem:[%s1363_s1 + $0x168] sm:$0xff]   ;;  %v1062_v47 = vld [vmem:[%s1363_s1 + $0x160] sm:$0xff]  }
  0x1b   :  { %v1059_v44 = vld [vmem:[%s1363_s1 + $0x130] sm:$0xff]   ;;  %v1061_v46 = vld [vmem:[%s1363_s1 + $0x128] sm:$0xff]   ;;  %v1063_v48 = vld [vmem:[%s1363_s1 + $0x120] sm:$0xff]  }
  0x1c   :  { %894 = vmatpush3.bf16.msra.mxu0 %v1038_v14  ;;  %474 = vmatprep.mubr.bf16.mxu0 %v40_v35  ;;  %v1064_v49 = vld [vmem:[%s1363_s1 + $0x158] sm:$0xff]   ;;  %v1066_v51 = vld [vmem:[%s1363_s1 + $0x150] sm:$0xff]   ;;  %v1072_v52 = vld [vmem:[%s1363_s1 + $0x180] sm:$0xff]  }
  0x1d   :  { %916 = vmatpush3.bf16.msra.mxu1 %v1039_v15  ;;  %895 = vmatprep.subr.bf16.mxu0 %v1040_v16  ;;  %v1065_v50 = vld [vmem:[%s1363_s1 + $0x118] sm:$0xff]   ;;  %v37_v53 = vld [vmem:[%s1362_s0 + $0x28] sm:$0xff]  ;;  %v38_v55 = vld [vmem:[%s1362_s0 + $0x30] sm:$0xff] }
  0x1e   :  { %917 = vmatprep.subr.bf16.mxu1 %v1041_v17  ;;  %v44_v54 = vpack.c.bf16 %v37_v53, %v37_v53  ;;  %v1067_v56 = vld [vmem:[%s1363_s1 + $0x110] sm:$0xff]   ;;  %v45_v57 = vpack.c.bf16 %v38_v55, %v38_v55  ;;  %v1068_v58 = vld [vmem:[%s1363_s1 + $0x148] sm:$0xff]   ;;  %v1070_v60 = vld [vmem:[%s1363_s1 + $0x140] sm:$0xff]  }
  0x1f   :  { %v1069_v59 = vld [vmem:[%s1363_s1 + $0x108] sm:$0xff]   ;;  %v1071_v61 = vld [vmem:[%s1363_s1 + $0x100] sm:$0xff]   ;;  %v1073_v0 = vld [vmem:[%s1364_s2 + $0x38] sm:$0xff]  }
  0x20   :  { %896 = vmatpush3.bf16.msra.mxu0 %v1042_v18  ;;  %v36_v62 = vld [vmem:[%s1362_s0 + $0x20] sm:$0xff]  ;;  %v1074_v1 = vld [vmem:[%s1364_s2 + $0x30] sm:$0xff]   ;;  %v1075_v2 = vld [vmem:[%s1364_s2 + $0x28] sm:$0xff]  }
  0x21   :  { %918 = vmatpush3.bf16.msra.mxu1 %v1043_v19  ;;  %897 = vmatprep.subr.bf16.mxu0 %v1044_v20  ;;  %v43_v63 = vpack.c.bf16 %v36_v62, %v36_v62  ;;  %v1076_v3 = vld [vmem:[%s1364_s2 + $0x20] sm:$0xff]   ;;  %v1077_v4 = vld [vmem:[%s1364_s2 + $0x18] sm:$0xff]   ;;  %v1078_v5 = vld [vmem:[%s1364_s2 + $0x10] sm:$0xff]  }
  0x22   :  { %919 = vmatprep.subr.bf16.mxu1 %v1045_v21  ;;  %v1079_v6 = vld [vmem:[%s1364_s2 + $0x8] sm:$0xff]   ;;  %v1080_v7 = vld [vmem:[%s1364_s2] sm:$0xff]   ;;  %v1081_v8 = vld [vmem:[#allocation2 + $0x38] sm:$0xff]  }
  0x23   :  { %v1082_v9 = vld [vmem:[#allocation2 + $0x30] sm:$0xff]   ;;  %v1083_v10 = vld [vmem:[#allocation2 + $0x28] sm:$0xff]   ;;  %v1084_v11 = vld [vmem:[#allocation2 + $0x20] sm:$0xff]  }
  0x24   :  { %898 = vmatpush3.bf16.msra.mxu0 %v1046_v22  ;;  %v1085_v12 = vld [vmem:[#allocation2 + $0x18] sm:$0xff]   ;;  %v1086_v13 = vld [vmem:[#allocation2 + $0x10] sm:$0xff]   ;;  %v1087_v14 = vld [vmem:[#allocation2 + $0x8] sm:$0xff]  }
  0x25   :  { %920 = vmatpush3.bf16.msra.mxu1 %v1047_v23  ;;  %899 = vmatprep.subr.bf16.mxu0 %v1048_v24 }
  0x26   :  { %921 = vmatprep.subr.bf16.mxu1 %v1049_v25 }
  0x28   :  { %900 = vmatpush3.bf16.msra.mxu0 %v1050_v26 }
  0x29   :  { %922 = vmatpush3.bf16.msra.mxu1 %v1051_v27  ;;  %901 = vmatprep.subr.bf16.mxu0 %v1052_v28 }
  0x2a   :  { %923 = vmatprep.subr.bf16.mxu1 %v1053_v29 }
  0x2c   :  { %902 = vmatpush3.bf16.msra.mxu0 %v1054_v30 }
  0x2d   :  { %924 = vmatpush3.bf16.msra.mxu1 %v1055_v31  ;;  %931 = vmatprep.subr.bf16.mxu0 %v1056_v40 }
  0x2e   :  { %973 = vmatprep.subr.bf16.mxu1 %v1114_v41 }
  0x2f   :  { %475 = vmatmul.mubr.bf16.vlgmr.msra.gmra.mxu0 %v39_v37 }
  0x30   :  { %515 = vmatmul.mubr.bf16.vlgmr.msra.gmra.mxu1 %v41_v39  ;;  %932 = vmatpush3.bf16.msra.mxu0 %v1057_v42  ;;  %v1088_v39 = vld [vmem:[#allocation2] sm:$0xff]  }
  0x31   :  { %975 = vmatprep.mubr.msk.bf16.mxu1 %vm1115_vm0, %v1114_v41  ;;  %933 = vmatprep.subr.bf16.mxu0 %v1058_v43 }
  0x32   :  { %974 = vmatpush3.bf16.msra.mxu1 %v1072_v52  ;;  %554 = vmatprep.mubr.bf16.mxu0 %v44_v54 }
  0x33   :  { %979 = vmatprep.subr.bf16.mxu1 %v1114_v41 }
  0x34   :  { %934 = vmatpush3.bf16.msra.mxu0 %v1059_v44 }
  0x35   :  { %935 = vmatprep.subr.bf16.mxu0 %v1060_v45 }
  0x38   :  { %936 = vmatpush3.bf16.msra.mxu0 %v1061_v46  ;;  %976 = vmatmul.mubr.msk.bf16.vlgmr.msra.gmra.mxu1 %vm438_vm1, %v45_v57 }
  0x39   :  { %937 = vmatprep.subr.bf16.mxu0 %v1062_v47  ;;  %995 = vmatprep.mubr.msk.bf16.mxu1 %vm1115_vm0, %v1114_v41 }
  0x3a   :  { %980 = vmatpush3.bf16.msra.mxu1 %v1073_v0 }
  0x3b   :  { %981 = vmatprep.subr.bf16.mxu1 %v1114_v41 }
  0x3c   :  { %938 = vmatpush3.bf16.msra.mxu0 %v1063_v48 }
  0x3d   :  { %939 = vmatprep.subr.bf16.mxu0 %v1064_v49 }
  0x3e   :  { %982 = vmatpush3.bf16.msra.mxu1 %v1074_v1 }
  0x3f   :  { %983 = vmatprep.subr.bf16.mxu1 %v1114_v41 }
  0x40   :  { %940 = vmatpush3.bf16.msra.mxu0 %v1065_v50 }
  0x41   :  { %941 = vmatprep.subr.bf16.mxu0 %v1066_v51 }
  0x42   :  { %984 = vmatpush3.bf16.msra.mxu1 %v1075_v2 }
  0x43   :  { %985 = vmatprep.subr.bf16.mxu1 %v1114_v41 }
  0x44   :  { %942 = vmatpush3.bf16.msra.mxu0 %v1067_v56 }
  0x45   :  { %943 = vmatprep.subr.bf16.mxu0 %v1068_v58 }
  0x46   :  { %986 = vmatpush3.bf16.msra.mxu1 %v1076_v3 }
  0x47   :  { %987 = vmatprep.subr.bf16.mxu1 %v1114_v41 }
  0x48   :  { %944 = vmatpush3.bf16.msra.mxu0 %v1069_v59 }
  0x49   :  { %945 = vmatprep.subr.bf16.mxu0 %v1070_v60 }
  0x4a   :  { %988 = vmatpush3.bf16.msra.mxu1 %v1077_v4 }
  0x4b   :  { %989 = vmatprep.subr.bf16.mxu1 %v1114_v41 }
  0x4c   :  { %946 = vmatpush3.bf16.msra.mxu0 %v1071_v61 }
  0x4d   :  { %999 = vmatprep.subr.bf16.mxu0 %v1114_v41 }
  0x4e   :  { %990 = vmatpush3.bf16.msra.mxu1 %v1078_v5 }
  0x4f   :  { %555 = vmatmul.mubr.bf16.vlgmr.msra.gmra.mxu0 %v43_v63  ;;  %991 = vmatprep.subr.bf16.mxu1 %v1114_v41 }
  0x50   :  { %1015 = vmatprep.mubr.msk.bf16.mxu0 %vm1115_vm0, %v1114_v41  ;;  %1000 = vmatpush3.bf16.msra.mxu0 %v1081_v8 }
  0x51   :  { %1001 = vmatprep.subr.bf16.mxu0 %v1114_v41 }
  0x52   :  { %992 = vmatpush3.bf16.msra.mxu1 %v1079_v6 }
  0x53   :  { %993 = vmatprep.subr.bf16.mxu1 %v1114_v41 }
  0x54   :  { %1002 = vmatpush3.bf16.msra.mxu0 %v1082_v9 }
  0x55   :  { %1003 = vmatprep.subr.bf16.mxu0 %v1114_v41 }
  0x56   :  { %994 = vmatpush3.bf16.msra.mxu1 %v1080_v7 }
  0x58   :  { %1004 = vmatpush3.bf16.msra.mxu0 %v1083_v10 }
  0x59   :  { %1005 = vmatprep.subr.bf16.mxu0 %v1114_v41 }
  0x5c   :  { %1006 = vmatpush3.bf16.msra.mxu0 %v1084_v11 }
  0x5d   :  { %1007 = vmatprep.subr.bf16.mxu0 %v1114_v41 }
  0x60   :  { %1008 = vmatpush3.bf16.msra.mxu0 %v1085_v12 }
  0x61   :  { %1009 = vmatprep.subr.bf16.mxu0 %v1114_v41 }
  0x64   :  { %1010 = vmatpush3.bf16.msra.mxu0 %v1086_v13 }
  0x65   :  { %1011 = vmatprep.subr.bf16.mxu0 %v1114_v41 }
  0x68   :  { %1012 = vmatpush3.bf16.msra.mxu0 %v1087_v14 }
  0x69   :  { %1013 = vmatprep.subr.bf16.mxu0 %v1114_v41 }
  0x6c   :  { %1014 = vmatpush3.bf16.msra.mxu0 %v1088_v39 }
  0xef   :  { %v903_v15 = vpop.f32.mrf.mxu0 }
  0xf0   :  { %v925_v16 = vpop.f32.mrf.mxu1 }
  0xf1   :  { %v904_v17 = vpop.f32.mrf.mxu0 }
  0xf2   :  { %v926_v18 = vpop.f32.mrf.mxu1  ;;  %v905_v27 = vadd.f32 %v904_v17, %v903_v15 }
  0xf3   :  { %v906_v19 = vpop.f32.mrf.mxu0  ;;  %v927_v28 = vadd.f32 %v926_v18, %v925_v16 }
  0xf4   :  { %v928_v20 = vpop.f32.mrf.mxu1 }
  0xf5   :  { %v907_v21 = vpop.f32.mrf.mxu0  ;;  %v517_v31 = vadd.f32 %v927_v28, %v905_v27 }
  0xf6   :  { %v929_v22 = vpop.f32.mrf.mxu1 }
  0xf8   :  { %v596_v23 = vpop.f32.mrf.mxu1 }
  0xfa   :  { %v977_v24 = vpop.f32.mrf.mxu1 }
  0xfc   :  { %v599_v25 = vpop.f32.mrf.mxu1 }
  0xfe   :  { %v978_v26 = vpop.f32.mrf.mxu1 }
 0x10f   :  { %v947_v29 = vpop.f32.mrf.mxu0 }
 0x111   :  { %v948_v30 = vpop.f32.mrf.mxu0 }
 0x112   :  { %v949_v32 = vadd.f32 %v948_v30, %v947_v29 }
 0x113   :  { %v950_v33 = vpop.f32.mrf.mxu0 }
 0x114   :  { %v557_v34 = vadd.f32 %v949_v32, %v517_v31 }
 0x115   :  { %v951_v35 = vpop.f32.mrf.mxu0 }
 0x116   :  { %v597_v36 = vadd.f32 %v596_v23, %v557_v34 }
 0x118   :  { %v602_v37 = vmax.f32 %v597_v36, 0.0 }
 0x11a   :  { %v603_v38 = vpack.c.bf16 %v602_v37, %v602_v37 }
 0x11c   :  { %996 = vmatmul.mubr.bf16.vlgmr.msra.gmra.mxu1 %v603_v38 }
 0x1dc   :  { %v702_v40 = vpop.f32.mrf.mxu1 }
 0x1dd   :  { %v708_v41 = vmax.f32 %v702_v40, 0.0 }
 0x1de   :  { %v997_v42 = vpop.f32.mrf.mxu1 }
 0x1df   :  { %v709_v43 = vpack.c.bf16 %v708_v41, %v708_v41 }
 0x1e0   :  { %v705_v44 = vpop.f32.mrf.mxu1 }
 0x1e1   :  { %1016 = vmatmul.mubr.bf16.vlgmr.msra.gmra.mxu0 %v709_v43 }
 0x1e2   :  { %v998_v45 = vpop.f32.mrf.mxu1 }
 0x2a1   :  { %v808_v46 = vpop.f32.mrf.mxu0 }
 0x2a2   :  { %v814_v47 = vpack.c.bf16 %v808_v46, %v808_v46 }
 0x2a3   :  { %v1017_v48 = vpop.f32.mrf.mxu0 }
 0x2a4   :  { %815 = vst [vmem:[%s1366_s4] sm:$0xf] %v814_v47 }
 0x2a5   :  { %v811_v49 = vpop.f32.mrf.mxu0 }
 0x2a7   :  { %v1018_v50 = vpop.f32.mrf.mxu0 }
 0x2a8   :  { %820 = vsyncpa [#allocation3], 1 }

</bundles_post_ra>
